<compile_context>
chip_gen: v7x
topology: tpu7x:2x2x1
jax: 0.10.0
libtpu: 0.0.40
codegen_flags: <defaults>
</compile_context>

<pallas_src>
import math

import jax
import jax.numpy as jnp
from jax.experimental import pallas as pl
from jax.experimental.pallas import tpu as pltpu


# ---------------------------------------------------------------------------
# Kernel: one (TB, CHUNK) tile of x plus the matching (1, CHUNK) PE tile.
# The sublane broadcast of pe across TB rows is done by the VPU; the add is
# performed in f32 (casts are free under a memory-bound roofline).
# ---------------------------------------------------------------------------
def _pe_add_kernel(x_ref, pe_ref, o_ref):
    # x_ref / o_ref : (TB, CHUNK) VMEM tiles in x.dtype; pe_ref : (1, CHUNK) f32.
    o_ref[...] = (x_ref[...].astype(jnp.float32) + pe_ref[...]).astype(o_ref.dtype)


def _build_pe_table(emb_size: int, max_len: int, dtype=jnp.float32) -> jnp.ndarray:
    """Sinusoidal table identical to the PyTorch __init__ (shape (max_len, emb))."""
    position = jnp.arange(0, max_len, dtype=jnp.float32)[:, None]            # (L, 1)
    div_term = jnp.exp(
        jnp.arange(0, emb_size, 2, dtype=jnp.float32)
        * -(math.log(10000.0) / emb_size)
    )                                                                         # (ceil(E/2),)
    angles = position * div_term                                              # (L, ceil(E/2))
    pe = jnp.zeros((max_len, emb_size), dtype=jnp.float32)
    pe = pe.at[:, 0::2].set(jnp.sin(angles))
    # Guard odd emb_size: cos columns are floor(E/2).
    pe = pe.at[:, 1::2].set(jnp.cos(angles)[:, : emb_size // 2])
    return pe.astype(dtype)


def _pick_rows(B: int, itemsize: int) -> int:
    """Dtype-aware sublane tile: 8 rows f32, 16 bf16, 32 int8/fp8 (if it divides B)."""
    packed = max(8, (8 * 4) // max(1, itemsize))
    for tb in (packed, 16, 8):
        if tb >= 8 and B % tb == 0:
            return tb
    return B  # full batch extent is always a legal block dim


def _pick_chunk(flat_size: int, itemsize: int, rows: int,
                target_bytes: int = 4 * 1024 * 1024) -> int:
    """Fixed lane-dense chunk (multiple of 128) so rows*chunk*itemsize ~= target.

    No exact-divisor requirement: the grid uses pl.cdiv(F, chunk) and Pallas
    masks the partial last block, so there are no 128-element cliffs and no
    giant fallback tiles when F % 128 != 0.
    """
    lane = 128
    max_elems = (target_bytes // max(1, rows * itemsize)) // lane * lane
    max_elems = max(lane, max_elems)
    f_pad = ((flat_size + lane - 1) // lane) * lane
    return min(max_elems, f_pad)


def _pe_add_flat(x2: jnp.ndarray, pe2: jnp.ndarray) -> jnp.ndarray:
    """x2: (B, F) activations; pe2: (1, F) float32 PE slab.  Returns x2 + pe2."""
    B, F = x2.shape
    itemsize = jnp.dtype(x2.dtype).itemsize

    TB = _pick_rows(B, itemsize)
    chunk = _pick_chunk(F, itemsize, TB)
    n_chunks = pl.cdiv(F, chunk)
    n_btiles = B // TB

    # Grid ordering: chunk axis outer keeps the PE block resident across the
    # inner batch loop.  With a single chunk the PE index is constant anyway,
    # so put the batch axis outer for a balanced 2-TensorCore split on v7x.
    if n_chunks > 1 or n_btiles == 1:
        grid = (n_chunks, n_btiles)
        x_map = lambda c, b: (b, c)
        pe_map = lambda c, b: (0, c)
    else:
        grid = (n_btiles, n_chunks)
        x_map = lambda b, c: (b, c)
        pe_map = lambda b, c: (0, c)

    # Explicit VMEM budget: double-buffered x-in + out tiles, double-buffered
    # PE tile, plus slack.  Stays well under v7x's 64 MiB physical VMEM and
    # overrides v5e's 16 MiB default scoped limit when needed.
    x_tile_bytes = TB * chunk * itemsize
    pe_tile_bytes = chunk * 4
    vmem_limit = 4 * x_tile_bytes + 2 * pe_tile_bytes + (4 << 20)
    vmem_limit = int(min(max(vmem_limit, 16 << 20), 56 << 20))

    cost = pl.CostEstimate(
        flops=B * F,
        transcendentals=0,
        bytes_accessed=2 * B * F * itemsize + F * 4,
    )

    return pl.pallas_call(
        _pe_add_kernel,
        out_shape=jax.ShapeDtypeStruct((B, F), x2.dtype),
        grid_spec=pltpu.PrefetchScalarGridSpec(
            num_scalar_prefetch=0,
            grid=grid,
            in_specs=[
                pl.BlockSpec((TB, chunk), x_map),    # x tile
                pl.BlockSpec((1, chunk), pe_map),    # shared PE tile
            ],
            out_specs=pl.BlockSpec((TB, chunk), x_map),
        ),
        compiler_params=pltpu.CompilerParams(
            dimension_semantics=("parallel", "parallel"),
            vmem_limit_bytes=vmem_limit,
        ),
        input_output_aliases={0: 0},   # donate the flattened activation buffer
        cost_estimate=cost,
    )(x2, pe2)


class PositionalEncodingPallas:
    """Mirror of the PyTorch module (eval-mode forward). Caches the flattened PE slab."""

    def __init__(self, emb_size: int, dropout: float = 0.1, max_len: int = 5000):
        self.emb_size = emb_size
        self.max_len = max_len
        self.dropout = dropout   # eval-mode: identity (see TODO at top of file)
        self.pe = _build_pe_table(emb_size, max_len)   # (max_len, emb), float32
        self._pe_flat_cache = {}                        # seq_len -> (1, S*E) f32 slab

    def __call__(self, x: jnp.ndarray) -> jnp.ndarray:
        B, S, E = x.shape
        if E != self.emb_size:
            raise ValueError(f"emb_size mismatch: {E} vs {self.emb_size}")
        if S > self.max_len:
            raise ValueError(f"seq_len {S} exceeds positional-encoding max_len {self.max_len}")

        pe2 = self._pe_flat_cache.get(S)
        if pe2 is None:
            pe2 = self.pe[:S, :].reshape(1, S * E)      # computed once per seq_len
            self._pe_flat_cache[S] = pe2

        x2 = x.reshape(B, S * E)
        out2 = _pe_add_flat(x2, pe2)
        return out2.reshape(B, S, E)


def positional_encoding_forward(x: jnp.ndarray, pe_table: jnp.ndarray) -> jnp.ndarray:
    """Functional entry point. x: (B, S, E); pe_table: (max_len, E)."""
    B, S, E = x.shape
    if S > pe_table.shape[0]:
        raise ValueError(f"seq_len {S} exceeds positional-encoding max_len {pe_table.shape[0]}")
    pe2 = pe_table[:S, :].astype(jnp.float32).reshape(1, S * E)
    out2 = _pe_add_flat(x.reshape(B, S * E), pe2)
    return out2.reshape(B, S, E)


if __name__ == "__main__":
    # Small shapes consistent with the module: (batch, seq, emb_size)
    batch, seq, emb_size = 2, 8, 32
    max_len = 5000

    key = jax.random.PRNGKey(0)
    x = jax.random.normal(key, (batch, seq, emb_size), dtype=jnp.float32)

    module = PositionalEncodingPallas(emb_size=emb_size, dropout=0.1, max_len=max_len)

    out = module(x)
    out = jax.block_until_ready(out)

    # Correctness check against a pure-JAX reference (eval-mode dropout == identity).
    ref = x + module.pe[None, :seq, :]
    assert out.shape == (batch, seq, emb_size)
    assert jnp.allclose(out, ref, atol=1e-6, rtol=1e-6), "mismatch vs reference"

    # Second call exercises the cached PE slab path.
    out2 = jax.block_until_ready(module(x))
    assert jnp.allclose(out2, ref, atol=1e-6, rtol=1e-6), "mismatch vs reference (cached)"

    print("KERNEL_OK")
</pallas_src>

<mosaic_0001>
module attributes {stable_mosaic.version = 11 : i64} {
  func.func @_pe_add_kernel(%arg0: i32, %arg1: i32, %arg2: memref<2x256xf32, #tpu.memory_space<vmem>>, %arg3: memref<1x256xf32, #tpu.memory_space<vmem>>, %arg4: memref<2x256xf32, #tpu.memory_space<vmem>>) attributes {dimension_semantics = [#tpu.dimension_semantics<parallel>, #tpu.dimension_semantics<parallel>], iteration_bounds = array<i64: 1, 1>, scalar_prefetch = 0 : i64, scratch_operands = 0 : i64, tpu.core_type = #tpu.core_type<tc>, window_params = [{transform_indices = @transform_0, window_bounds = array<i64: 2, 256>}, {transform_indices = @transform_1, window_bounds = array<i64: 1, 256>}, {transform_indices = @transform_2, window_bounds = array<i64: 2, 256>}]} {
    %c0 = arith.constant 0 : index
    %c0_0 = arith.constant 0 : index
    %0 = vector.load %arg2[%c0, %c0_0] : memref<2x256xf32, #tpu.memory_space<vmem>>, vector<2x256xf32>
    %c0_1 = arith.constant 0 : index
    %c0_2 = arith.constant 0 : index
    %1 = vector.load %arg3[%c0_1, %c0_2] : memref<1x256xf32, #tpu.memory_space<vmem>>, vector<1x256xf32>
    %2 = vector.broadcast %1 : vector<1x256xf32> to vector<2x256xf32>
    %3 = arith.addf %0, %2 : vector<2x256xf32>
    %c0_3 = arith.constant 0 : index
    %c0_4 = arith.constant 0 : index
    %4 = vector.load %arg4[%c0_3, %c0_4] : memref<2x256xf32, #tpu.memory_space<vmem>>, vector<2x256xf32>
    tpu.vector_store %arg4[%c0_3, %c0_4], %3 {strides = array<i32>} : memref<2x256xf32, #tpu.memory_space<vmem>>, vector<2x256xf32>,
    return
  }
  func.func @transform_0(%arg0: i32, %arg1: i32) -> (i32, i32) {
    %c0_i32 = arith.constant 0 : i32
    return %arg1, %arg0 : i32, i32
  }
  func.func @transform_1(%arg0: i32, %arg1: i32) -> (i32, i32) {
    %c0_i32 = arith.constant 0 : i32
    %c0_i32_0 = arith.constant 0 : i32
    return %c0_i32, %arg0 : i32, i32
  }
  func.func @transform_2(%arg0: i32, %arg1: i32) -> (i32, i32) {
    %c0_i32 = arith.constant 0 : i32
    return %arg1, %arg0 : i32, i32
  }
}

</mosaic_0001>

<bundles_post_ra>
// kernel: tpu_custom_call.1
= control target key start
LH: loop header
LB: loop body
LE: loop exit
PB: predicated region body
PF: predicated region fallthrough
CT: control target
= control target key end

     0   :  { %7 = vsyncpa [#allocation3], 0  ;;  %s157_s0 = inlined_call_operand.hbm [shape: f32[2,256], index: 0, kind: input, shape index: {}, may-alias: {0,2}]   ;;  %s158_s1 = inlined_call_operand.vmem [shape: f32[1,256], index: 1, kind: input, shape index: {}]   ;;  %s159_s2 = inlined_call_operand.hbm [shape: f32[2,256], index: 2, kind: output, shape index: {}, may-alias: {0,2}]  }
   0x1   :  { %8 = vsyncpa [#allocation4], 0  ;;  %s112_s9 = smov [#allocation2]   ;;  %s64_s13 = scalar_lea.hbm %s157_s0, 64 }
   0x2   :  { %s15_s10 = sshll.u32 %s112_s9, 4  ;;  %p65_p0 = scmp.ne.s32.totalorder %s157_s0, %s64_s13  ;;  %s16_s10 = int_to_ptr.vmem [resolvable:$true] %s15_s10 }
   0x3   :  { %p68_p1 = scmp.lt.u32.totalorder %s64_s13, %s157_s0 }
   0x5   :  { %p70_p2 = pnand %p68_p1, %p65_p0 }
   0x7   :  { %73 = shalt.err (!%p70_p2)
}
   0x8   :  { %s74_s18 = scalar_lea.vmem %s16_s10, 64  ;;  %p79_p4 = scmp.lt.s32.totalorder %s16_s10, %s16_s10 }
   0x9   :  { %p75_p3 = scmp.ne.s32.totalorder %s16_s10, %s74_s18  ;;  %p80_p5 = scmp.lt.s32.totalorder %s74_s18, %s74_s18 }
   0xb   :  { %p81_p6 = por %p80_p5, %p79_p4 }
   0xd   :  { %p82_p7 = pnand %p81_p6, %p75_p3 }
   0xf   :  { %85 = shalt.err (!%p82_p7)
}
  0x10   :  { %18 = dma.hbm_to_vmem [thread:$0]  %s157_s0, 64, %s16_s10, [#allocation3]  }
  0x11   :  { %108 = dma.done.wait [#allocation3], 64  }
  0x12   :  { %109 = vsyncadd [#allocation3], 4294967232  ;;  %v27_v0 = vlaneseq  ;;  %v113_v1 = vmov 1983009808   ;;  %v25_v7 = vld [vmem:[%s158_s1] sm:$0x3] }
  0x13   :  { %v37_v2 = vunpack.c.l.s4 %v113_v1  ;;  %v24_v12 = vld [vmem:[#allocation2] sm:$0xf]  ;;  %s114_s23 = smov [#allocation5]  }
  0x14   :  { %v28_v3 = vshrl.u32 %v27_v0, 7  ;;  %s52_s0 = sshll.u32 %s114_s23, 4  ;;  %s53_s0 = int_to_ptr.vmem [resolvable:$true] %s52_s0 }
  0x15   :  { %v38_v6 = vunpack.c.0.s8 %v37_v2  ;;  %s86_s24 = scalar_lea.vmem %s53_s0, 64  ;;  %p91_p9 = scmp.lt.s32.totalorder %s53_s0, %s53_s0 }
  0x16   :  { %v29_v4 = vsub.s32 0, %v28_v3  ;;  %v33_v5 = vsub.s32 1, %v28_v3  ;;  %p87_p8 = scmp.ne.s32.totalorder %s53_s0, %s86_s24  ;;  %p92_p10 = scmp.lt.s32.totalorder %s86_s24, %s86_s24 }
  0x17   :  { %v41_v10 = vsub.s32 %v38_v6, %v28_v3 }
  0x18   :  { %v30_v8 = vrot.slane %v25_v7, %v29_v4  ;;  %v34_v9 = vrot.slane %v25_v7, %v33_v5  ;;  %p93_p11 = por %p92_p10, %p91_p9 }
  0x1a   :  { %v35_v11 = vcombine.low %v30_v8, %v34_v9  ;;  %p94_p12 = pnand %p93_p11, %p87_p8 }
  0x1c   :  { %v42_v13 = vrot.slane %v35_v11, %v41_v10 }
  0x1e   :  { %v44_v14 = vadd.f32 %v42_v13, %v24_v12 }
  0x20   :  { %45 = vst [vmem:[#allocation5] sm:$0xf] %v44_v14 }
  0x21   :  { %97 = shalt.err (!%p94_p12)
}
  0x22   :  { %s98_s26 = scalar_lea.hbm %s159_s2, 64 }
  0x23   :  { %p99_p13 = scmp.ne.s32.totalorder %s159_s2, %s98_s26  ;;  %p102_p0 = scmp.lt.u32.totalorder %s98_s26, %s159_s2 }
  0x25   :  { %p104_p1 = pnand %p102_p0, %p99_p13 }
  0x27   :  { %107 = shalt.err (!%p104_p1)
}
  0x28   :  { %55 = dma.vmem_to_hbm [thread:$0]  %s53_s0, 64, %s159_s2, [#allocation4]  }
  0x29   :  { %110 = dma.done.wait [#allocation4], 64  }
  0x2a   :  { %111 = vsyncadd [#allocation4], 4294967232 }
  0x2b   :  { %59 = vsyncpa [#allocation3], 1 }
  0x2c   :  { %60 = vsyncpa [#allocation4], 1 }

</bundles_post_ra>
